<compile_context>
chip_gen: v5e
topology: v5e:2x2
jax: 0.10.0
libtpu: 0.0.40
codegen_flags: <defaults>
</compile_context>

<pallas_src>
import functools
import math

import jax
import jax.numpy as jnp
from jax import lax
from jax.experimental import pallas as pl
from jax.experimental.pallas import tpu as pltpu

_LANES = 128
_EARTH_RADIUS_KM = 6371.0

# cos(x) for |x| <= pi via an even Taylor/Horner polynomial in t = x**2
# (terms through x**18; truncation error <= pi**20/20! ~ 3.6e-9, well inside the
# 2e-8 budget of the asin approximation).  All haversine arguments are bounded
# (|dlat| <= pi, |lat1+lat2| <= pi, |dlon|/2 <= pi for lat in [-90,90] deg and
# lon in [-180,180] deg), so no range reduction / quadrant folding is needed.
_COS_COEFFS = tuple((-1.0) ** k / math.factorial(2 * k) for k in range(9, -1, -1))


def _cos_bounded(x):
    t = x * x
    p = jnp.float32(_COS_COEFFS[0])
    for coef in _COS_COEFFS[1:]:
        p = p * t + jnp.float32(coef)
    return p


def _asin_poly(x):
    """arcsin(x) for x in [0, 1] via Abramowitz & Stegun 4.4.46 (|err| <= 2e-8)."""
    p = jnp.float32(-0.0012624911)
    p = p * x + jnp.float32(0.0066700901)
    p = p * x + jnp.float32(-0.0170881256)
    p = p * x + jnp.float32(0.0308918810)
    p = p * x + jnp.float32(-0.0501743046)
    p = p * x + jnp.float32(0.0889789874)
    p = p * x + jnp.float32(-0.2145988016)
    p = p * x + jnp.float32(1.5707963050)
    return jnp.float32(math.pi / 2) - jnp.sqrt(jnp.float32(1.0) - x) * p


def _combined_loss_kernel(plat_ref, plon_ref, tlat_ref, tlon_ref,
                          sq_ref, hav_ref, *, n_last_valid):
    block_rows = plat_ref.shape[0]

    plat = plat_ref[...]
    plon = plon_ref[...]
    tlat = tlat_ref[...]
    tlon = tlon_ref[...]

    # ---- MSE partial (on raw degree values, like nn.MSELoss) ----
    dlat_deg = tlat - plat
    dlon_deg = tlon - plon
    sq = dlat_deg * dlat_deg + dlon_deg * dlon_deg           # (BR, 128)

    # ---- Haversine via product-to-sum identities (3 bounded-domain cos) ----
    #   sin^2(dlat/2)         = (1 - cos(dlat)) / 2
    #   cos(lat1) * cos(lat2) = (cos(dlat) + cos(lat1 + lat2)) / 2
    #   sin^2(dlon/2)         = (1 - cos(dlon)) / 2,  cos(dlon) = 2*cos^2(dlon/2) - 1
    d2r = jnp.float32(math.pi / 180.0)
    half_d2r = jnp.float32(0.5 * math.pi / 180.0)
    cdlat = _cos_bounded(dlat_deg * d2r)                     # |dlat|      <= pi
    clsum = _cos_bounded((plat + tlat) * d2r)                # |lat1+lat2| <= pi
    chalf = _cos_bounded(dlon_deg * half_d2r)                # |dlon/2|    <= pi
    cdlon = jnp.float32(2.0) * chalf * chalf - jnp.float32(1.0)

    a = (jnp.float32(0.5) * (jnp.float32(1.0) - cdlat)
         + jnp.float32(0.25) * (cdlat + clsum) * (jnp.float32(1.0) - cdlon))
    a = jnp.clip(a, 0.0, 1.0)     # fp cancellation guard -- keeps sqrt/asin real
    c = jnp.float32(2.0) * _asin_poly(jnp.sqrt(a))           # (BR, 128)

    def _reduce8(x):              # (block_rows, 128) -> lane-dense (8, 128) partial
        return jnp.sum(x.reshape(block_rows // 8, 8, _LANES), axis=0)

    # Padded samples were zero-padded, so their sq is exactly zero: no mask needed.
    sq_ref[...] = _reduce8(sq)

    # Padding only exists in the final tile; mask only there (asin_poly(0) != 0
    # would otherwise bias the haversine mean).  The iota/compare/select work is
    # skipped on all earlier tiles.
    last = pl.num_programs(0) - 1

    @pl.when(pl.program_id(0) != last)
    def _():
        hav_ref[...] = _reduce8(c)

    @pl.when(pl.program_id(0) == last)
    def _():
        row_ids = lax.broadcasted_iota(jnp.int32, (block_rows, _LANES), 0)
        lane_ids = lax.broadcasted_iota(jnp.int32, (block_rows, _LANES), 1)
        in_tile_idx = row_ids * _LANES + lane_ids            # < 2^31 always
        hav_ref[...] = _reduce8(
            jnp.where(in_tile_idx < n_last_valid, c, jnp.float32(0.0)))


def _round_up(x, m):
    return ((x + m - 1) // m) * m


@functools.partial(jax.jit, static_argnames=("hav_weight",))
def combined_loss(pred, target, hav_weight=0.3):
    """JAX/Pallas equivalent of CombinedLoss.forward -> (loss, mse, hav)."""
    n, two = pred.shape
    assert two == 2, "expected [N, 2] (lat, lon) predictions"

    pred = pred.astype(jnp.float32)
    target = target.astype(jnp.float32)

    rows_needed = -(-n // _LANES)
    # Tile sizing: multiple of 8 sublanes; split into >= 2 steps whenever the data
    # spans > 8 rows (so the 'parallel' axis shards across both v7x TensorCores);
    # cap at 2048 rows = 1 MiB/input/step (4 inputs x 2 pipeline buffers = 8 MiB).
    block_rows = max(8, min(2048, _round_up(-(-rows_needed // 2), 8)))
    padded_rows = _round_up(rows_needed, block_rows)
    grid_steps = padded_rows // block_rows
    n_pad = padded_rows * _LANES
    n_last_valid = n - (grid_steps - 1) * block_rows * _LANES   # valid in final tile

    def _to_lane_dense(col):
        # Stays inside the same jit as the pallas_call so XLA fuses the pad/reshape
        # into a single HBM pass feeding the kernel.
        return jnp.pad(col, (0, n_pad - n)).reshape(padded_rows, _LANES)

    plat = _to_lane_dense(pred[:, 0])
    plon = _to_lane_dense(pred[:, 1])
    tlat = _to_lane_dense(target[:, 0])
    tlon = _to_lane_dense(target[:, 1])

    in_spec = pl.BlockSpec((block_rows, _LANES), lambda i: (i, 0))
    out_spec = pl.BlockSpec((8, _LANES), lambda i: (i, 0))

    sq_parts, hav_parts = pl.pallas_call(
        functools.partial(_combined_loss_kernel, n_last_valid=n_last_valid),
        grid=(grid_steps,),
        in_specs=[in_spec, in_spec, in_spec, in_spec],
        out_specs=(out_spec, out_spec),
        out_shape=(
            jax.ShapeDtypeStruct((grid_steps * 8, _LANES), jnp.float32),
            jax.ShapeDtypeStruct((grid_steps * 8, _LANES), jnp.float32),
        ),
        compiler_params=pltpu.CompilerParams(
            dimension_semantics=("parallel",),
            vmem_limit_bytes=32 * 1024 * 1024,  # explicit: raises v5e's 16 MiB default
        ),
    )(plat, plon, tlat, tlon)

    # nn.MSELoss(reduction='mean') divides by the total element count (N * 2).
    mse = jnp.sum(sq_parts) / jnp.float32(n * 2)
    hav = jnp.float32(_EARTH_RADIUS_KM) * (jnp.sum(hav_parts) / jnp.float32(n))
    loss = (1.0 - hav_weight) * mse + hav_weight * hav
    return loss, mse, hav


if __name__ == "__main__":
    key = jax.random.PRNGKey(0)
    k_pred, k_targ = jax.random.split(key)

    # 1500 samples -> 12 lane-dense rows -> 2 grid steps, last tile partially
    # padded, exercising both the multi-step path and the last-tile mask.
    n = 1500
    pred = jnp.stack(
        [
            jax.random.uniform(k_pred, (n,), jnp.float32, -90.0, 90.0),
            jax.random.uniform(jax.random.fold_in(k_pred, 1), (n,), jnp.float32, -180.0, 180.0),
        ],
        axis=1,
    )
    target = jnp.stack(
        [
            jax.random.uniform(k_targ, (n,), jnp.float32, -90.0, 90.0),
            jax.random.uniform(jax.random.fold_in(k_targ, 1), (n,), jnp.float32, -180.0, 180.0),
        ],
        axis=1,
    )

    loss, mse, hav = combined_loss(pred, target, hav_weight=0.3)
    jax.block_until_ready((loss, mse, hav))

    # Lightweight pure-JAX reference (mirrors the PyTorch module) for sanity.
    def _ref(pred, target, w=0.3):
        mse_r = jnp.mean((pred - target) ** 2)
        d2r = math.pi / 180.0
        lat1, lon1 = pred[:, 0] * d2r, pred[:, 1] * d2r
        lat2, lon2 = target[:, 0] * d2r, target[:, 1] * d2r
        a = (jnp.sin((lat2 - lat1) / 2) ** 2
             + jnp.cos(lat1) * jnp.cos(lat2) * jnp.sin((lon2 - lon1) / 2) ** 2)
        hav_r = jnp.mean(2 * jnp.arcsin(jnp.sqrt(a)) * 6371.0)
        return (1 - w) * mse_r + w * hav_r, mse_r, hav_r

    ref_vals = _ref(pred, target, 0.3)
    for got, want in zip((loss, mse, hav), ref_vals):
        assert jnp.allclose(got, want, rtol=1e-4, atol=1e-2), (got, want)

    print("KERNEL_OK")
</pallas_src>

<mosaic_0001>
module attributes {stable_mosaic.version = 11 : i64} {
  func.func @_combined_loss_kernel(%arg0: i32, %arg1: memref<8x128xf32, #tpu.memory_space<vmem>>, %arg2: memref<8x128xf32, #tpu.memory_space<vmem>>, %arg3: memref<8x128xf32, #tpu.memory_space<vmem>>, %arg4: memref<8x128xf32, #tpu.memory_space<vmem>>, %arg5: memref<8x128xf32, #tpu.memory_space<vmem>>, %arg6: memref<8x128xf32, #tpu.memory_space<vmem>>) attributes {dimension_semantics = [#tpu.dimension_semantics<parallel>], iteration_bounds = array<i64: 2>, scalar_prefetch = 0 : i64, scratch_operands = 0 : i64, tpu.core_type = #tpu.core_type<tc>, window_params = [{transform_indices = @transform_0, window_bounds = array<i64: 8, 128>}, {transform_indices = @transform_1, window_bounds = array<i64: 8, 128>}, {transform_indices = @transform_2, window_bounds = array<i64: 8, 128>}, {transform_indices = @transform_3, window_bounds = array<i64: 8, 128>}, {transform_indices = @transform_4, window_bounds = array<i64: 8, 128>}, {transform_indices = @transform_5, window_bounds = array<i64: 8, 128>}]} {
    %c0 = arith.constant 0 : index
    %c0_0 = arith.constant 0 : index
    %0 = vector.load %arg1[%c0, %c0_0] : memref<8x128xf32, #tpu.memory_space<vmem>>, vector<8x128xf32>
    %c0_1 = arith.constant 0 : index
    %c0_2 = arith.constant 0 : index
    %1 = vector.load %arg2[%c0_1, %c0_2] : memref<8x128xf32, #tpu.memory_space<vmem>>, vector<8x128xf32>
    %c0_3 = arith.constant 0 : index
    %c0_4 = arith.constant 0 : index
    %2 = vector.load %arg3[%c0_3, %c0_4] : memref<8x128xf32, #tpu.memory_space<vmem>>, vector<8x128xf32>
    %c0_5 = arith.constant 0 : index
    %c0_6 = arith.constant 0 : index
    %3 = vector.load %arg4[%c0_5, %c0_6] : memref<8x128xf32, #tpu.memory_space<vmem>>, vector<8x128xf32>
    %4 = arith.subf %2, %0 : vector<8x128xf32>
    %5 = arith.subf %3, %1 : vector<8x128xf32>
    %6 = arith.mulf %4, %4 : vector<8x128xf32>
    %7 = arith.mulf %5, %5 : vector<8x128xf32>
    %8 = arith.addf %6, %7 : vector<8x128xf32>
    %cst = arith.constant 0.0174532924 : f32
    %9 = vector.broadcast %cst : f32 to vector<8x128xf32>
    %10 = arith.mulf %4, %9 : vector<8x128xf32>
    %11 = arith.mulf %10, %10 : vector<8x128xf32>
    %cst_7 = arith.constant -1.56192068E-16 : f32
    %12 = vector.broadcast %cst_7 : f32 to vector<8x128xf32>
    %13 = arith.mulf %12, %11 : vector<8x128xf32>
    %cst_8 = arith.constant 4.77947726E-14 : f32
    %14 = vector.broadcast %cst_8 : f32 to vector<8x128xf32>
    %15 = arith.addf %13, %14 : vector<8x128xf32>
    %16 = arith.mulf %15, %11 : vector<8x128xf32>
    %cst_9 = arith.constant -1.14707454E-11 : f32
    %17 = vector.broadcast %cst_9 : f32 to vector<8x128xf32>
    %18 = arith.addf %16, %17 : vector<8x128xf32>
    %19 = arith.mulf %18, %11 : vector<8x128xf32>
    %cst_10 = arith.constant 2.08767559E-9 : f32
    %20 = vector.broadcast %cst_10 : f32 to vector<8x128xf32>
    %21 = arith.addf %19, %20 : vector<8x128xf32>
    %22 = arith.mulf %21, %11 : vector<8x128xf32>
    %cst_11 = arith.constant -2.755732E-7 : f32
    %23 = vector.broadcast %cst_11 : f32 to vector<8x128xf32>
    %24 = arith.addf %22, %23 : vector<8x128xf32>
    %25 = arith.mulf %24, %11 : vector<8x128xf32>
    %cst_12 = arith.constant 2.48015876E-5 : f32
    %26 = vector.broadcast %cst_12 : f32 to vector<8x128xf32>
    %27 = arith.addf %25, %26 : vector<8x128xf32>
    %28 = arith.mulf %27, %11 : vector<8x128xf32>
    %cst_13 = arith.constant -0.00138888892 : f32
    %29 = vector.broadcast %cst_13 : f32 to vector<8x128xf32>
    %30 = arith.addf %28, %29 : vector<8x128xf32>
    %31 = arith.mulf %30, %11 : vector<8x128xf32>
    %cst_14 = arith.constant 0.0416666679 : f32
    %32 = vector.broadcast %cst_14 : f32 to vector<8x128xf32>
    %33 = arith.addf %31, %32 : vector<8x128xf32>
    %34 = arith.mulf %33, %11 : vector<8x128xf32>
    %cst_15 = arith.constant -5.000000e-01 : f32
    %35 = vector.broadcast %cst_15 : f32 to vector<8x128xf32>
    %36 = arith.addf %34, %35 : vector<8x128xf32>
    %37 = arith.mulf %36, %11 : vector<8x128xf32>
    %cst_16 = arith.constant 1.000000e+00 : f32
    %38 = vector.broadcast %cst_16 : f32 to vector<8x128xf32>
    %39 = arith.addf %37, %38 : vector<8x128xf32>
    %40 = arith.addf %0, %2 : vector<8x128xf32>
    %cst_17 = arith.constant 0.0174532924 : f32
    %41 = vector.broadcast %cst_17 : f32 to vector<8x128xf32>
    %42 = arith.mulf %40, %41 : vector<8x128xf32>
    %43 = arith.mulf %42, %42 : vector<8x128xf32>
    %cst_18 = arith.constant -1.56192068E-16 : f32
    %44 = vector.broadcast %cst_18 : f32 to vector<8x128xf32>
    %45 = arith.mulf %44, %43 : vector<8x128xf32>
    %cst_19 = arith.constant 4.77947726E-14 : f32
    %46 = vector.broadcast %cst_19 : f32 to vector<8x128xf32>
    %47 = arith.addf %45, %46 : vector<8x128xf32>
    %48 = arith.mulf %47, %43 : vector<8x128xf32>
    %cst_20 = arith.constant -1.14707454E-11 : f32
    %49 = vector.broadcast %cst_20 : f32 to vector<8x128xf32>
    %50 = arith.addf %48, %49 : vector<8x128xf32>
    %51 = arith.mulf %50, %43 : vector<8x128xf32>
    %cst_21 = arith.constant 2.08767559E-9 : f32
    %52 = vector.broadcast %cst_21 : f32 to vector<8x128xf32>
    %53 = arith.addf %51, %52 : vector<8x128xf32>
    %54 = arith.mulf %53, %43 : vector<8x128xf32>
    %cst_22 = arith.constant -2.755732E-7 : f32
    %55 = vector.broadcast %cst_22 : f32 to vector<8x128xf32>
    %56 = arith.addf %54, %55 : vector<8x128xf32>
    %57 = arith.mulf %56, %43 : vector<8x128xf32>
    %cst_23 = arith.constant 2.48015876E-5 : f32
    %58 = vector.broadcast %cst_23 : f32 to vector<8x128xf32>
    %59 = arith.addf %57, %58 : vector<8x128xf32>
    %60 = arith.mulf %59, %43 : vector<8x128xf32>
    %cst_24 = arith.constant -0.00138888892 : f32
    %61 = vector.broadcast %cst_24 : f32 to vector<8x128xf32>
    %62 = arith.addf %60, %61 : vector<8x128xf32>
    %63 = arith.mulf %62, %43 : vector<8x128xf32>
    %cst_25 = arith.constant 0.0416666679 : f32
    %64 = vector.broadcast %cst_25 : f32 to vector<8x128xf32>
    %65 = arith.addf %63, %64 : vector<8x128xf32>
    %66 = arith.mulf %65, %43 : vector<8x128xf32>
    %cst_26 = arith.constant -5.000000e-01 : f32
    %67 = vector.broadcast %cst_26 : f32 to vector<8x128xf32>
    %68 = arith.addf %66, %67 : vector<8x128xf32>
    %69 = arith.mulf %68, %43 : vector<8x128xf32>
    %cst_27 = arith.constant 1.000000e+00 : f32
    %70 = vector.broadcast %cst_27 : f32 to vector<8x128xf32>
    %71 = arith.addf %69, %70 : vector<8x128xf32>
    %cst_28 = arith.constant 0.00872664619 : f32
    %72 = vector.broadcast %cst_28 : f32 to vector<8x128xf32>
    %73 = arith.mulf %5, %72 : vector<8x128xf32>
    %74 = arith.mulf %73, %73 : vector<8x128xf32>
    %cst_29 = arith.constant -1.56192068E-16 : f32
    %75 = vector.broadcast %cst_29 : f32 to vector<8x128xf32>
    %76 = arith.mulf %75, %74 : vector<8x128xf32>
    %cst_30 = arith.constant 4.77947726E-14 : f32
    %77 = vector.broadcast %cst_30 : f32 to vector<8x128xf32>
    %78 = arith.addf %76, %77 : vector<8x128xf32>
    %79 = arith.mulf %78, %74 : vector<8x128xf32>
    %cst_31 = arith.constant -1.14707454E-11 : f32
    %80 = vector.broadcast %cst_31 : f32 to vector<8x128xf32>
    %81 = arith.addf %79, %80 : vector<8x128xf32>
    %82 = arith.mulf %81, %74 : vector<8x128xf32>
    %cst_32 = arith.constant 2.08767559E-9 : f32
    %83 = vector.broadcast %cst_32 : f32 to vector<8x128xf32>
    %84 = arith.addf %82, %83 : vector<8x128xf32>
    %85 = arith.mulf %84, %74 : vector<8x128xf32>
    %cst_33 = arith.constant -2.755732E-7 : f32
    %86 = vector.broadcast %cst_33 : f32 to vector<8x128xf32>
    %87 = arith.addf %85, %86 : vector<8x128xf32>
    %88 = arith.mulf %87, %74 : vector<8x128xf32>
    %cst_34 = arith.constant 2.48015876E-5 : f32
    %89 = vector.broadcast %cst_34 : f32 to vector<8x128xf32>
    %90 = arith.addf %88, %89 : vector<8x128xf32>
    %91 = arith.mulf %90, %74 : vector<8x128xf32>
    %cst_35 = arith.constant -0.00138888892 : f32
    %92 = vector.broadcast %cst_35 : f32 to vector<8x128xf32>
    %93 = arith.addf %91, %92 : vector<8x128xf32>
    %94 = arith.mulf %93, %74 : vector<8x128xf32>
    %cst_36 = arith.constant 0.0416666679 : f32
    %95 = vector.broadcast %cst_36 : f32 to vector<8x128xf32>
    %96 = arith.addf %94, %95 : vector<8x128xf32>
    %97 = arith.mulf %96, %74 : vector<8x128xf32>
    %cst_37 = arith.constant -5.000000e-01 : f32
    %98 = vector.broadcast %cst_37 : f32 to vector<8x128xf32>
    %99 = arith.addf %97, %98 : vector<8x128xf32>
    %100 = arith.mulf %99, %74 : vector<8x128xf32>
    %cst_38 = arith.constant 1.000000e+00 : f32
    %101 = vector.broadcast %cst_38 : f32 to vector<8x128xf32>
    %102 = arith.addf %100, %101 : vector<8x128xf32>
    %cst_39 = arith.constant 2.000000e+00 : f32
    %103 = vector.broadcast %cst_39 : f32 to vector<8x128xf32>
    %104 = arith.mulf %103, %102 : vector<8x128xf32>
    %105 = arith.mulf %104, %102 : vector<8x128xf32>
    %cst_40 = arith.constant 1.000000e+00 : f32
    %106 = vector.broadcast %cst_40 : f32 to vector<8x128xf32>
    %107 = arith.subf %105, %106 : vector<8x128xf32>
    %cst_41 = arith.constant 1.000000e+00 : f32
    %108 = vector.broadcast %cst_41 : f32 to vector<8x128xf32>
    %109 = arith.subf %108, %39 : vector<8x128xf32>
    %cst_42 = arith.constant 5.000000e-01 : f32
    %110 = vector.broadcast %cst_42 : f32 to vector<8x128xf32>
    %111 = arith.mulf %110, %109 : vector<8x128xf32>
    %112 = arith.addf %39, %71 : vector<8x128xf32>
    %cst_43 = arith.constant 2.500000e-01 : f32
    %113 = vector.broadcast %cst_43 : f32 to vector<8x128xf32>
    %114 = arith.mulf %113, %112 : vector<8x128xf32>
    %cst_44 = arith.constant 1.000000e+00 : f32
    %115 = vector.broadcast %cst_44 : f32 to vector<8x128xf32>
    %116 = arith.subf %115, %107 : vector<8x128xf32>
    %117 = arith.mulf %114, %116 : vector<8x128xf32>
    %118 = arith.addf %111, %117 : vector<8x128xf32>
    %cst_45 = arith.constant 0.000000e+00 : f32
    %cst_46 = arith.constant 1.000000e+00 : f32
    %119 = vector.broadcast %cst_45 : f32 to vector<8x128xf32>
    %120 = arith.maximumf %119, %118 : vector<8x128xf32>
    %121 = vector.broadcast %cst_46 : f32 to vector<8x128xf32>
    %122 = arith.minimumf %121, %120 : vector<8x128xf32>
    %123 = math.sqrt %122 : vector<8x128xf32>
    %cst_47 = arith.constant -0.0012624911 : f32
    %124 = vector.broadcast %cst_47 : f32 to vector<8x128xf32>
    %125 = arith.mulf %124, %123 : vector<8x128xf32>
    %cst_48 = arith.constant 6.670090e-03 : f32
    %126 = vector.broadcast %cst_48 : f32 to vector<8x128xf32>
    %127 = arith.addf %125, %126 : vector<8x128xf32>
    %128 = arith.mulf %127, %123 : vector<8x128xf32>
    %cst_49 = arith.constant -0.0170881264 : f32
    %129 = vector.broadcast %cst_49 : f32 to vector<8x128xf32>
    %130 = arith.addf %128, %129 : vector<8x128xf32>
    %131 = arith.mulf %130, %123 : vector<8x128xf32>
    %cst_50 = arith.constant 0.0308918804 : f32
    %132 = vector.broadcast %cst_50 : f32 to vector<8x128xf32>
    %133 = arith.addf %131, %132 : vector<8x128xf32>
    %134 = arith.mulf %133, %123 : vector<8x128xf32>
    %cst_51 = arith.constant -0.0501743034 : f32
    %135 = vector.broadcast %cst_51 : f32 to vector<8x128xf32>
    %136 = arith.addf %134, %135 : vector<8x128xf32>
    %137 = arith.mulf %136, %123 : vector<8x128xf32>
    %cst_52 = arith.constant 0.0889789909 : f32
    %138 = vector.broadcast %cst_52 : f32 to vector<8x128xf32>
    %139 = arith.addf %137, %138 : vector<8x128xf32>
    %140 = arith.mulf %139, %123 : vector<8x128xf32>
    %cst_53 = arith.constant -0.214598805 : f32
    %141 = vector.broadcast %cst_53 : f32 to vector<8x128xf32>
    %142 = arith.addf %140, %141 : vector<8x128xf32>
    %143 = arith.mulf %142, %123 : vector<8x128xf32>
    %cst_54 = arith.constant 1.57079625 : f32
    %144 = vector.broadcast %cst_54 : f32 to vector<8x128xf32>
    %145 = arith.addf %143, %144 : vector<8x128xf32>
    %cst_55 = arith.constant 1.000000e+00 : f32
    %146 = vector.broadcast %cst_55 : f32 to vector<8x128xf32>
    %147 = arith.subf %146, %123 : vector<8x128xf32>
    %148 = math.sqrt %147 : vector<8x128xf32>
    %149 = arith.mulf %148, %145 : vector<8x128xf32>
    %cst_56 = arith.constant 1.57079637 : f32
    %150 = vector.broadcast %cst_56 : f32 to vector<8x128xf32>
    %151 = arith.subf %150, %149 : vector<8x128xf32>
    %cst_57 = arith.constant 2.000000e+00 : f32
    %152 = vector.broadcast %cst_57 : f32 to vector<8x128xf32>
    %153 = arith.mulf %152, %151 : vector<8x128xf32>
    %154 = vector.shape_cast %8 : vector<8x128xf32> to vector<1x8x128xf32>
    %cst_58 = arith.constant dense<0.000000e+00> : vector<8x128xf32>
    %155 = vector.multi_reduction <add>, %154, %cst_58 [0] : vector<1x8x128xf32> to vector<8x128xf32>
    %c0_59 = arith.constant 0 : index
    %c0_60 = arith.constant 0 : index
    %156 = vector.load %arg5[%c0_59, %c0_60] : memref<8x128xf32, #tpu.memory_space<vmem>>, vector<8x128xf32>
    tpu.vector_store %arg5[%c0_59, %c0_60], %155 {strides = array<i32>} : memref<8x128xf32, #tpu.memory_space<vmem>>, vector<8x128xf32>,
    %c1_i32 = arith.constant 1 : i32
    %157 = arith.cmpi ne, %arg0, %c1_i32 : i32
    %158 = arith.extui %157 : i1 to i32
    %c0_i32 = arith.constant 0 : i32
    %159 = arith.cmpi ne, %158, %c0_i32 : i32
    scf.if %159 {
      %163 = vector.shape_cast %153 : vector<8x128xf32> to vector<1x8x128xf32>
      %cst_63 = arith.constant dense<0.000000e+00> : vector<8x128xf32>
      %164 = vector.multi_reduction <add>, %163, %cst_63 [0] : vector<1x8x128xf32> to vector<8x128xf32>
      %c0_64 = arith.constant 0 : index
      %c0_65 = arith.constant 0 : index
      %165 = vector.load %arg6[%c0_64, %c0_65] : memref<8x128xf32, #tpu.memory_space<vmem>>, vector<8x128xf32>
      tpu.vector_store %arg6[%c0_64, %c0_65], %164 {strides = array<i32>} : memref<8x128xf32, #tpu.memory_space<vmem>>, vector<8x128xf32>,
    } else {
    }
    %c1_i32_61 = arith.constant 1 : i32
    %160 = arith.cmpi eq, %arg0, %c1_i32_61 : i32
    %161 = arith.extui %160 : i1 to i32
    %c0_i32_62 = arith.constant 0 : i32
    %162 = arith.cmpi ne, %161, %c0_i32_62 : i32
    scf.if %162 {
      %163 = tpu.iota {dimensions = array<i32: 0>} : vector<8x128xi32>
      %164 = tpu.iota {dimensions = array<i32: 1>} : vector<8x128xi32>
      %c128_i32 = arith.constant 128 : i32
      %165 = vector.broadcast %c128_i32 : i32 to vector<8x128xi32>
      %166 = arith.muli %163, %165 : vector<8x128xi32>
      %167 = arith.addi %166, %164 : vector<8x128xi32>
      %c476_i32 = arith.constant 476 : i32
      %168 = vector.broadcast %c476_i32 : i32 to vector<8x128xi32>
      %169 = arith.cmpi slt, %167, %168 : vector<8x128xi32>
      %cst_63 = arith.constant 0.000000e+00 : f32
      %170 = vector.broadcast %cst_63 : f32 to vector<8x128xf32>
      %171 = arith.select %169, %153, %170 : vector<8x128xi1>, vector<8x128xf32>
      %172 = vector.shape_cast %171 : vector<8x128xf32> to vector<1x8x128xf32>
      %cst_64 = arith.constant dense<0.000000e+00> : vector<8x128xf32>
      %173 = vector.multi_reduction <add>, %172, %cst_64 [0] : vector<1x8x128xf32> to vector<8x128xf32>
      %c0_65 = arith.constant 0 : index
      %c0_66 = arith.constant 0 : index
      %174 = vector.load %arg6[%c0_65, %c0_66] : memref<8x128xf32, #tpu.memory_space<vmem>>, vector<8x128xf32>
      tpu.vector_store %arg6[%c0_65, %c0_66], %173 {strides = array<i32>} : memref<8x128xf32, #tpu.memory_space<vmem>>, vector<8x128xf32>,
    } else {
    }
    return
  }
  func.func @transform_0(%arg0: i32) -> (i32, i32) {
    %c0_i32 = arith.constant 0 : i32
    %c0_i32_0 = arith.constant 0 : i32
    return %arg0, %c0_i32 : i32, i32
  }
  func.func @transform_1(%arg0: i32) -> (i32, i32) {
    %c0_i32 = arith.constant 0 : i32
    %c0_i32_0 = arith.constant 0 : i32
    return %arg0, %c0_i32 : i32, i32
  }
  func.func @transform_2(%arg0: i32) -> (i32, i32) {
    %c0_i32 = arith.constant 0 : i32
    %c0_i32_0 = arith.constant 0 : i32
    return %arg0, %c0_i32 : i32, i32
  }
  func.func @transform_3(%arg0: i32) -> (i32, i32) {
    %c0_i32 = arith.constant 0 : i32
    %c0_i32_0 = arith.constant 0 : i32
    return %arg0, %c0_i32 : i32, i32
  }
  func.func @transform_4(%arg0: i32) -> (i32, i32) {
    %c0_i32 = arith.constant 0 : i32
    %c0_i32_0 = arith.constant 0 : i32
    return %arg0, %c0_i32 : i32, i32
  }
  func.func @transform_5(%arg0: i32) -> (i32, i32) {
    %c0_i32 = arith.constant 0 : i32
    %c0_i32_0 = arith.constant 0 : i32
    return %arg0, %c0_i32 : i32, i32
  }
}

</mosaic_0001>

<bundles_post_ra>
// kernel: combined_loss.1
= control target key start
LH: loop header
LB: loop body
LE: loop exit
PB: predicated region body
PF: predicated region fallthrough
CT: control target
= control target key end

     0   :  { %s614_s18 = smov 0   ;;  %s653_s0 = inlined_call_operand.vmem [shape: f32[16,128], index: 0, kind: input, shape index: {}]   ;;  %s654_s1 = inlined_call_operand.vmem [shape: f32[16,128], index: 1, kind: input, shape index: {}]   ;;  %s655_s2 = inlined_call_operand.vmem [shape: f32[16,128], index: 2, kind: input, shape index: {}]   ;;  %s656_s3 = inlined_call_operand.vmem [shape: f32[16,128], index: 3, kind: input, shape index: {}]   ;;  %s657_s4 = inlined_call_operand.vmem [shape: f32[16,128], index: 4, kind: output, shape index: {0}]   ;;  %s658_s5 = inlined_call_operand.vmem [shape: f32[16,128], index: 5, kind: output, shape index: {1}]  }
   0x1 LB: > { %s620_s19 = sadd.s32 4294967295, %s582_s18   ;;  %p552_p0 = scmp.ge.s32.totalorder %s582_s18, 1  ;;  %s582_s18 = sphi %s614_s18, %s16_s18  }
   0x2   : > { %p216_p1 = scmp.lt.s32.totalorder %s582_s18, 3 }
   0x4   : > { %p217_p2 = pnand %p552_p0, %p216_p1 }
   0x5   : > { %p258_p3 = scmp.lt.s32.totalorder (!%p217_p2), %s620_s19, 1  ;;  %p560_p4 = scmp.eq.s32.totalorder (!%p217_p2), %s620_s19, 1 }
   0x6   : > { %220 = sbr.rel (%p217_p2) target bundleno = 151 (0x97), region = 36 }
   0xb   : > { %s259_s20 = scalar_select %p258_p3, %s620_s19, 1 }
   0xd   : > { %s553_s21 = sshll.u32 %s259_s20, 3 }
   0xe   : > { %s261_s24 = scalar_lea.vmem %s653_s0, %s553_s21  ;;  %s265_s27 = scalar_lea.vmem %s654_s1, %s553_s21 }
   0xf   : > { %s269_s30 = scalar_lea.vmem %s655_s2, %s553_s21  ;;  %s273_s8 = scalar_lea.vmem %s656_s3, %s553_s21  ;;  %v282_v0 = vld [vmem:[%s261_s24] sm:$0xff] }
  0x10   : > { %v283_v1 = vld [vmem:[%s265_s27] sm:$0xff]  ;;  %s641_s11 = scalar_lea.vmem %s658_s5, %s553_s21  ;;  %s277_s14 = scalar_lea.vmem %s657_s4, %s553_s21 }
  0x11   : > { %v284_v2 = vld [vmem:[%s269_s30] sm:$0xff] }
  0x12   : > { %v285_v3 = vld [vmem:[%s273_s8] sm:$0xff]  ;;  %v286_v4 = vsub.f32 %v284_v2, %v282_v0  ;;  %v311_v6 = vadd.f32 %v284_v2, %v282_v0 }
  0x13   : > { %v287_v5 = vsub.f32 %v285_v3, %v283_v1 }
  0x14   : > { %v288_v7 = vmul.f32 %v286_v4, %v286_v4  ;;  %v291_v9 = vmul.f32 0.017453292, %v286_v4  ;;  %v312_v10 = vmul.f32 0.017453292, %v311_v6 }
  0x15   : > { %v289_v8 = vmul.f32 %v287_v5, %v287_v5  ;;  %v332_v11 = vmul.f32 0.008726646, %v287_v5 }
  0x16   : > { %v292_v13 = vmul.f32 %v291_v9, %v291_v9  ;;  %v313_v14 = vmul.f32 %v312_v10, %v312_v10 }
  0x17   : > { %v290_v12 = vadd.f32 %v289_v8, %v288_v7  ;;  %v333_v15 = vmul.f32 %v332_v11, %v332_v11 }
  0x18   : > { %v293_v16 = vmul.f32 -1.5619207e-16, %v292_v13  ;;  %v314_v17 = vmul.f32 -1.5619207e-16, %v313_v14 }
  0x19   : > { %407 = vst [vmem:[%s277_s14] sm:$0xff] %v290_v12  ;;  %v334_v18 = vmul.f32 -1.5619207e-16, %v333_v15 }
  0x1a   : > { %v294_v19 = vadd.f32 4.7794773e-14, %v293_v16  ;;  %v315_v20 = vadd.f32 4.7794773e-14, %v314_v17 }
  0x1b   : > { %v335_v21 = vadd.f32 4.7794773e-14, %v334_v18 }
  0x1c   : > { %v295_v22 = vmul.f32 %v294_v19, %v292_v13  ;;  %v316_v23 = vmul.f32 %v315_v20, %v313_v14 }
  0x1d   : > { %v336_v24 = vmul.f32 %v335_v21, %v333_v15 }
  0x1e   : > { %v296_v25 = vadd.f32 -1.1470745e-11, %v295_v22  ;;  %v317_v26 = vadd.f32 -1.1470745e-11, %v316_v23 }
  0x1f   : > { %v337_v27 = vadd.f32 -1.1470745e-11, %v336_v24 }
  0x20   : > { %v297_v28 = vmul.f32 %v296_v25, %v292_v13  ;;  %v318_v29 = vmul.f32 %v317_v26, %v313_v14 }
  0x21   : > { %v338_v30 = vmul.f32 %v337_v27, %v333_v15 }
  0x22   : > { %v298_v31 = vadd.f32 2.0876756e-09, %v297_v28  ;;  %v319_v32 = vadd.f32 2.0876756e-09, %v318_v29 }
  0x23   : > { %v339_v33 = vadd.f32 2.0876756e-09, %v338_v30 }
  0x24   : > { %v299_v34 = vmul.f32 %v298_v31, %v292_v13  ;;  %v320_v35 = vmul.f32 %v319_v32, %v313_v14 }
  0x25   : > { %v340_v36 = vmul.f32 %v339_v33, %v333_v15 }
  0x26   : > { %v300_v37 = vadd.f32 -2.755732e-07, %v299_v34  ;;  %v321_v38 = vadd.f32 -2.755732e-07, %v320_v35 }
  0x27   : > { %v341_v39 = vadd.f32 -2.755732e-07, %v340_v36 }
  0x28   : > { %v301_v40 = vmul.f32 %v300_v37, %v292_v13  ;;  %v322_v41 = vmul.f32 %v321_v38, %v313_v14 }
  0x29   : > { %v342_v42 = vmul.f32 %v341_v39, %v333_v15 }
  0x2a   : > { %v302_v43 = vadd.f32 2.4801588e-05, %v301_v40  ;;  %v323_v44 = vadd.f32 2.4801588e-05, %v322_v41 }
  0x2b   : > { %v343_v45 = vadd.f32 2.4801588e-05, %v342_v42 }
  0x2c   : > { %v303_v46 = vmul.f32 %v302_v43, %v292_v13  ;;  %v324_v47 = vmul.f32 %v323_v44, %v313_v14 }
  0x2d   : > { %v344_v48 = vmul.f32 %v343_v45, %v333_v15 }
  0x2e   : > { %v304_v49 = vadd.f32 -0.0013888889, %v303_v46  ;;  %v325_v50 = vadd.f32 -0.0013888889, %v324_v47 }
  0x2f   : > { %v345_v51 = vadd.f32 -0.0013888889, %v344_v48 }
  0x30   : > { %v305_v52 = vmul.f32 %v304_v49, %v292_v13  ;;  %v326_v53 = vmul.f32 %v325_v50, %v313_v14 }
  0x31   : > { %v346_v54 = vmul.f32 %v345_v51, %v333_v15 }
  0x32   : > { %v306_v55 = vadd.f32 0.041666668, %v305_v52  ;;  %v327_v56 = vadd.f32 0.041666668, %v326_v53 }
  0x33   : > { %v347_v57 = vadd.f32 0.041666668, %v346_v54 }
  0x34   : > { %v307_v58 = vmul.f32 %v306_v55, %v292_v13  ;;  %v328_v59 = vmul.f32 %v327_v56, %v313_v14 }
  0x35   : > { %v348_v60 = vmul.f32 %v347_v57, %v333_v15 }
  0x36   : > { %v308_v61 = vadd.f32 -0.5, %v307_v58  ;;  %v329_v62 = vadd.f32 -0.5, %v328_v59 }
  0x37   : > { %v349_v63 = vadd.f32 -0.5, %v348_v60 }
  0x38   : > { %v309_v0 = vmul.f32 %v308_v61, %v292_v13  ;;  %v330_v1 = vmul.f32 %v329_v62, %v313_v14 }
  0x39   : > { %v350_v2 = vmul.f32 %v349_v63, %v333_v15 }
  0x3a   : > { %v310_v3 = vadd.f32 1.0, %v309_v0  ;;  %v331_v4 = vadd.f32 1.0, %v330_v1 }
  0x3b   : > { %v351_v5 = vadd.f32 1.0, %v350_v2 }
  0x3c   : > { %v357_v7 = vadd.f32 %v331_v4, %v310_v3  ;;  %v355_v9 = vsub.f32 1.0, %v310_v3 }
  0x3d   : > { %v352_v6 = vmul.f32 2.0, %v351_v5 }
  0x3e   : > { %v358_v11 = vmul.f32 0.25, %v357_v7  ;;  %v356_v12 = vmul.f32 0.5, %v355_v9 }
  0x3f   : > { %v353_v8 = vmul.f32 %v352_v6, %v351_v5 }
  0x41   : > { %v559_v10 = vadd.f32 -1.0, %v353_v8 }
  0x43   : > { %v359_v16 = vsub.f32 1.0, %v559_v10 }
  0x45   : > { %v360_v17 = vmul.f32 %v359_v16, %v358_v11 }
  0x47   : > { %v361_v18 = vadd.f32 %v360_v17, %v356_v12 }
  0x49   : > { %v362_v19 = vmax.f32 %v361_v18, 0.0 }
  0x4b   : > { %v363_v20 = vmin.f32 %v362_v19, 1.0 }
  0x4d   : > { %572 = vrsqrt.f32 %v363_v20  ;;  %vm371_vm0 = vcmp.eq.f32.partialorder %v363_v20, inf  ;;  %v374_v24 = vand.u32 2147483648, %v363_v20  ;;  %vm373_vm1 = vcmp.eq.f32.partialorder %v363_v20, 0.0 }
  0x53   : > { %v573_v21 = vpop.eup %572 }
  0x54   : > { %v365_v13 = vmul.f32 %v573_v21, %v363_v20 }
  0x56   : > { %v366_v14 = vmul.f32 %v573_v21, %v365_v13 }
  0x58   : > { %v367_v15 = vmul.f32 0.5, %v366_v14 }
  0x5a   : > { %v368_v22 = vsub.f32 1.5, %v367_v15 }
  0x5c   : > { %v369_v23 = vmul.f32 %v573_v21, %v368_v22 }
  0x5e   : > { %v370_v25 = vmul.f32 %v369_v23, %v363_v20 }
  0x60   : > { %v372_v26 = vsel %vm371_vm0, %v363_v20, %v370_v25 }
  0x61   : > { %v375_v27 = vsel %vm373_vm1, %v374_v24, %v372_v26 }
  0x62   : > { %v376_v28 = vmul.f32 -0.0012624911, %v375_v27  ;;  %v390_v29 = vsub.f32 1.0, %v375_v27 }
  0x64   : > { %v377_v30 = vadd.f32 0.00667009, %v376_v28  ;;  %574 = vrsqrt.f32 %v390_v29  ;;  %vm398_vm2 = vcmp.eq.f32.partialorder %v390_v29, inf  ;;  %v401_v47 = vand.u32 2147483648, %v390_v29 }
  0x65   : > { %vm400_vm3 = vcmp.eq.f32.partialorder %v390_v29, 0.0 }
  0x66   : > { %v378_v31 = vmul.f32 %v377_v30, %v375_v27 }
  0x68   : > { %v379_v32 = vadd.f32 -0.017088126, %v378_v31 }
  0x6a   : > { %v575_v33 = vpop.eup %574  ;;  %v380_v34 = vmul.f32 %v379_v32, %v375_v27 }
  0x6b   : > { %v392_v35 = vmul.f32 %v575_v33, %v390_v29 }
  0x6c   : > { %v381_v36 = vadd.f32 0.03089188, %v380_v34 }
  0x6d   : > { %v393_v37 = vmul.f32 %v575_v33, %v392_v35 }
  0x6e   : > { %v382_v38 = vmul.f32 %v381_v36, %v375_v27 }
  0x6f   : > { %v394_v39 = vmul.f32 0.5, %v393_v37 }
  0x70   : > { %v383_v40 = vadd.f32 -0.050174303, %v382_v38 }
  0x71   : > { %v395_v41 = vsub.f32 1.5, %v394_v39 }
  0x72   : > { %v384_v42 = vmul.f32 %v383_v40, %v375_v27 }
  0x73   : > { %v396_v43 = vmul.f32 %v575_v33, %v395_v41 }
  0x74   : > { %v385_v44 = vadd.f32 0.08897899, %v384_v42 }
  0x75   : > { %v397_v45 = vmul.f32 %v396_v43, %v390_v29 }
  0x76   : > { %v386_v46 = vmul.f32 %v385_v44, %v375_v27 }
  0x77   : > { %v399_v49 = vsel %vm398_vm2, %v390_v29, %v397_v45 }
  0x78   : > { %v387_v48 = vadd.f32 -0.2145988, %v386_v46  ;;  %v402_v51 = vsel %vm400_vm3, %v401_v47, %v399_v49 }
  0x7a   : > { %v388_v50 = vmul.f32 %v387_v48, %v375_v27 }
  0x7c   : > { %v389_v52 = vadd.f32 1.5707963, %v388_v50 }
  0x7e   : > { %v403_v53 = vmul.f32 %v402_v51, %v389_v52  ;;  %411 = sbr.rel (%p560_p4) target bundleno = 133 (0x85), region = 40 }
  0x80   : > { %v404_v54 = vsub.f32 1.5707964, %v403_v53 }
  0x82   : > { %v405_v55 = vmul.f32 2.0, %v404_v54 }
  0x84   : > { %413 = vst [vmem:[%s641_s11] sm:$0xff] %v405_v55 }
  0x85 PF: > { %p561_p5 = scmp.ne.s32.totalorder %s620_s19, 1 }
  0x87   : > { %417 = sbr.rel (%p561_p5) target bundleno = 151 (0x97), region = 44 }
  0x8c   : > { %v418_v56 = vlaneseq }
  0x8e   : > { %v419_v57 = vshrl.u32 %v418_v56, 7  ;;  %v421_v58 = vand.u32 127, %v418_v56 }
  0x90   : > { %v422_v59 = vmul.u32 128, %v419_v57 }
  0x92   : > { %v423_v60 = vadd.s32 %v422_v59, %v421_v58 }
  0x94   : > { %vm424_vm4 = vcmp.lt.s32.totalorder %v423_v60, 476 }
  0x95   : > { %v425_v61 = vsel %vm424_vm4, %v405_v55, 0.0 }
  0x96   : > { %427 = vst [vmem:[%s641_s11] sm:$0xff] %v425_v61 }
  0x97 PF: > { %s16_s18 = sadd.s32 1, %s582_s18  }
  0x98   : > { %p13_p6 = scmp.ge.s32.totalorder %s16_s18, 4  }
  0x9a   :  { %15 = sbr.rel (!%p13_p6) target bundleno = 1 (0x1), region = 95 }

</bundles_post_ra>
